<compile_context>
chip_gen: v7x
topology: tpu7x:2x2x1
jax: 0.10.0
libtpu: 0.0.40
codegen_flags: <defaults>
</compile_context>

<pallas_src>
import math
import functools

import jax
import jax.numpy as jnp
from jax.experimental import pallas as pl
from jax.experimental.pallas import tpu as pltpu


# ----------------------------- Pallas kernel --------------------------------

def _round_up(x, m):
    return ((x + m - 1) // m) * m


def _make_fused_kernel(ak_cols):
    """backbone conv + ReLU -> encoder 1x1 + ReLU -> fused cls/reg heads -> sigmoid(cls)."""
    def kernel(p_ref, wb_ref, bb_ref, we_ref, be_ref, wh_ref, bh_ref, o_ref):
        # backbone: im2col patches (TM, Kpad) bf16 @ (Kpad, Cf) bf16 -> f32 acc
        feat = jnp.dot(p_ref[...], wb_ref[...], preferred_element_type=jnp.float32)
        feat = jnp.maximum(feat + bb_ref[...], 0.0)
        # encoder: 1x1 conv (+ReLU), feat stays resident in VMEM/vregs
        fp5 = jnp.dot(feat.astype(jnp.bfloat16), we_ref[...],
                      preferred_element_type=jnp.float32)
        fp5 = jnp.maximum(fp5 + be_ref[...], 0.0)
        # decoder heads: [cls (A*K) || reg (A*4) || zero-pad] concatenated to 128 lanes
        h = jnp.dot(fp5.astype(jnp.bfloat16), wh_ref[...],
                    preferred_element_type=jnp.float32)
        h = h + bh_ref[...]
        # sigmoid only on the cls columns (EUP slot, ~free); reg columns stay raw deltas
        col = jax.lax.broadcasted_iota(jnp.int32, h.shape, 1)
        o_ref[...] = jnp.where(col < ak_cols, jax.nn.sigmoid(h), h)
    return kernel


def fused_forward_pallas(patches_bf16, w_b, b_b, w_e, b_e, w_h, b_h,
                         ak_cols, tm=512):
    """One pallas_call for the whole conv/head stack, tiled over rows (M)."""
    M, Kp = patches_bf16.shape
    Cf = w_b.shape[1]
    Np = w_h.shape[1]

    # v7x VMEM budget note: tile<=512 keeps 2x double-buffered (tm,Kp)+(tm,Np) tiles tiny.
    tm = min(tm, _round_up(M, 8))
    Mp = _round_up(M, tm)
    if Mp != M:
        patches_bf16 = jnp.pad(patches_bf16, ((0, Mp - M), (0, 0)))

    out = pl.pallas_call(
        _make_fused_kernel(ak_cols),
        out_shape=jax.ShapeDtypeStruct((Mp, Np), jnp.float32),
        grid=(Mp // tm,),
        in_specs=[
            pl.BlockSpec((tm, Kp), lambda i: (i, 0)),   # im2col patch rows (tiled)
            pl.BlockSpec((Kp, Cf), lambda i: (0, 0)),   # backbone weight (replicated)
            pl.BlockSpec((1, Cf), lambda i: (0, 0)),    # backbone bias
            pl.BlockSpec((Cf, Cf), lambda i: (0, 0)),   # encoder weight
            pl.BlockSpec((1, Cf), lambda i: (0, 0)),    # encoder bias
            pl.BlockSpec((Cf, Np), lambda i: (0, 0)),   # fused head weight (128 lanes)
            pl.BlockSpec((1, Np), lambda i: (0, 0)),    # fused head bias
        ],
        out_specs=pl.BlockSpec((tm, Np), lambda i: (i, 0)),
        compiler_params=pltpu.CompilerParams(
            dimension_semantics=("parallel",)),
    )(patches_bf16, w_b, b_b, w_e, b_e, w_h, b_h)
    return out[:M]


# ------------------------------- glue (JAX) ----------------------------------

def im2col_mean_pad(x_nhwc, k, stride, pad, pad_value_c):
    """Patch extraction with per-channel constant (pixel_mean) border padding.

    Padding with pixel_mean makes the mean/std-folded conv exactly equivalent to
    conv of the zero-padded normalized image.
    -> (N, Ho, Wo, k*k*C), Ho, Wo
    """
    N, H, W, C = x_nhwc.shape
    Hp, Wp = H + 2 * pad, W + 2 * pad
    base = jnp.broadcast_to(pad_value_c.reshape(1, 1, 1, C).astype(x_nhwc.dtype),
                            (N, Hp, Wp, C))
    x = jax.lax.dynamic_update_slice(base, x_nhwc, (0, pad, pad, 0))
    Ho = (Hp - k) // stride + 1
    Wo = (Wp - k) // stride + 1
    # TODO(synk): at real image sizes (800x1333) this patch tensor should be built
    #             inside the kernel (strided window gather) instead of in HBM.
    patches = []
    for di in range(k):
        for dj in range(k):
            patches.append(x[:, di:di + stride * Ho:stride,
                              dj:dj + stride * Wo:stride, :])
    return jnp.concatenate(patches, axis=-1), Ho, Wo


def apply_deltas(deltas, anchors, scale_clamp=math.log(1000.0 / 16)):
    """Box2BoxTransform.apply_deltas with weights (1,1,1,1). deltas/anchors: (R, 4) xyxy."""
    widths = anchors[:, 2] - anchors[:, 0]
    heights = anchors[:, 3] - anchors[:, 1]
    ctr_x = anchors[:, 0] + 0.5 * widths
    ctr_y = anchors[:, 1] + 0.5 * heights
    dx, dy, dw, dh = deltas[:, 0], deltas[:, 1], deltas[:, 2], deltas[:, 3]
    dw = jnp.minimum(dw, scale_clamp)
    dh = jnp.minimum(dh, scale_clamp)
    pred_ctr_x = dx * widths + ctr_x
    pred_ctr_y = dy * heights + ctr_y
    pred_w = jnp.exp(dw) * widths
    pred_h = jnp.exp(dh) * heights
    return jnp.stack([pred_ctr_x - 0.5 * pred_w,
                      pred_ctr_y - 0.5 * pred_h,
                      pred_ctr_x + 0.5 * pred_w,
                      pred_ctr_y + 0.5 * pred_h], axis=-1)


def generate_anchors(hf, wf, stride, sizes):
    """Single-level anchor generator: (Hf*Wf*A, 4) xyxy, A = len(sizes)."""
    ys = (jnp.arange(hf, dtype=jnp.float32) + 0.5) * stride
    xs = (jnp.arange(wf, dtype=jnp.float32) + 0.5) * stride
    cy, cx = jnp.meshgrid(ys, xs, indexing="ij")              # (Hf, Wf)
    cx = cx[:, :, None]
    cy = cy[:, :, None]
    s = jnp.asarray(sizes, dtype=jnp.float32)[None, None, :]  # (1,1,A)
    anchors = jnp.stack([cx - 0.5 * s, cy - 0.5 * s, cx + 0.5 * s, cy + 0.5 * s],
                        axis=-1)                               # (Hf, Wf, A, 4)
    return anchors.reshape(-1, 4)


def _inference_single(probs_i, deltas_i, anchors, num_classes, num_topk,
                      score_threshold, max_det):
    """inference_single_image: top-k, threshold, delta decode (vmapped over images)."""
    predicted_prob, topk_idxs = jax.lax.top_k(probs_i, num_topk)
    keep = predicted_prob > score_threshold
    anchor_idxs = topk_idxs // num_classes
    class_idxs = topk_idxs % num_classes
    boxes = apply_deltas(deltas_i[anchor_idxs], anchors[anchor_idxs])
    masked_scores = jnp.where(keep, predicted_prob, -1.0)
    nd = min(max_det, num_topk)
    top_scores, order = jax.lax.top_k(masked_scores, nd)
    return (boxes[order], top_scores, class_idxs[order],
            top_scores > score_threshold)


# ------------------------------- YOLOF model ---------------------------------

class YOLOFPallas:
    def __init__(self, key,
                 num_classes=8, num_anchors=5,
                 in_channels=3, feat_channels=64,
                 backbone_stride=4,
                 pixel_mean=(103.530, 116.280, 123.675),
                 pixel_std=(57.375, 57.12, 58.395),
                 score_thresh_test=0.05, topk_candidates_test=1000,
                 max_detections_per_image=100):
        self.num_classes = num_classes
        self.A = num_anchors
        self.C_in = in_channels
        self.C_feat = feat_channels
        self.stride = backbone_stride
        self.score_threshold = score_thresh_test
        self.topk_candidates_test = topk_candidates_test
        self.max_detections_per_image = max_detections_per_image
        self.anchor_sizes = [8.0, 16.0, 32.0, 64.0, 128.0][:num_anchors]

        self.pixel_mean = jnp.asarray(pixel_mean, jnp.float32)   # (C,)
        self.pixel_std = jnp.asarray(pixel_std, jnp.float32)     # (C,)

        k = jax.random.split(key, 8)
        K9 = 3 * 3 * in_channels                                  # 27
        # raw (pre-fold) parameters
        w_backbone = 0.1 * jax.random.normal(k[0], (K9, feat_channels), jnp.float32)
        b_backbone = 0.01 * jax.random.normal(k[1], (feat_channels,), jnp.float32)
        w_encoder = 0.1 * jax.random.normal(k[2], (feat_channels, feat_channels), jnp.float32)
        b_encoder = 0.01 * jax.random.normal(k[3], (feat_channels,), jnp.float32)
        w_cls = 0.1 * jax.random.normal(k[4], (feat_channels, num_anchors * num_classes), jnp.float32)
        b_cls = jnp.full((num_anchors * num_classes,), -2.0, jnp.float32)  # prior-like bias
        w_reg = 0.1 * jax.random.normal(k[5], (feat_channels, num_anchors * 4), jnp.float32)
        b_reg = 0.01 * jax.random.normal(k[6], (num_anchors * 4,), jnp.float32)

        # ---- fold (x - mean)/std into the backbone conv (affine) -------------
        # row r of the im2col weight corresponds to input channel r % C_in
        mean_rows = jnp.tile(self.pixel_mean, (K9 // in_channels,))     # (27,)
        std_rows = jnp.tile(self.pixel_std, (K9 // in_channels,))       # (27,)
        w_b_eff = w_backbone / std_rows[:, None]                         # (27, Cf)
        b_b_eff = b_backbone - (w_b_eff * mean_rows[:, None]).sum(axis=0)

        # ---- pad K (27 -> 32) for tile-friendly MXU feeds ---------------------
        self.K_pad = _round_up(K9, 32)
        w_b_eff = jnp.pad(w_b_eff, ((0, self.K_pad - K9), (0, 0)))

        # ---- lane-pad and fuse the decoder heads: [cls | reg | 0] -> 128 lanes -
        n_cls = num_anchors * num_classes         # 40
        n_reg = num_anchors * 4                   # 20
        self.N_cls = n_cls
        self.N_reg = n_reg
        self.N_pad = 128
        w_head = jnp.zeros((feat_channels, self.N_pad), jnp.float32)
        w_head = w_head.at[:, :n_cls].set(w_cls)
        w_head = w_head.at[:, n_cls:n_cls + n_reg].set(w_reg)
        b_head = jnp.zeros((self.N_pad,), jnp.float32)
        b_head = b_head.at[:n_cls].set(b_cls)
        b_head = b_head.at[n_cls:n_cls + n_reg].set(b_reg)

        # ---- kernel-ready parameters (bf16 operands, f32 bias/epilogue) --------
        self.w_backbone = w_b_eff.astype(jnp.bfloat16)            # (Kpad, Cf)
        self.b_backbone = b_b_eff.reshape(1, feat_channels)       # f32
        self.w_encoder = w_encoder.astype(jnp.bfloat16)           # (Cf, Cf)
        self.b_encoder = b_encoder.reshape(1, feat_channels)      # f32
        self.w_head = w_head.astype(jnp.bfloat16)                 # (Cf, 128)
        self.b_head = b_head.reshape(1, self.N_pad)               # f32

    def forward(self, images_nchw):
        """Eval-mode forward: returns per-image (boxes, scores, classes, valid_mask)."""
        N, C, H, W = images_nchw.shape
        K = self.num_classes
        A = self.A

        # NCHW -> NHWC (normalization is folded into the conv weights; no extra pass)
        x_nhwc = jnp.transpose(images_nchw, (0, 2, 3, 1))

        # im2col with pixel_mean border padding (exactly matches zero-padded normalized conv)
        patches, Hf, Wf = im2col_mean_pad(x_nhwc, k=3, stride=self.stride, pad=1,
                                          pad_value_c=self.pixel_mean)
        M = N * Hf * Wf
        patches = patches.reshape(M, -1)
        patches = jnp.pad(patches, ((0, 0), (0, self.K_pad - patches.shape[1])))
        patches = patches.astype(jnp.bfloat16)

        # ---- single fused Pallas kernel: backbone + encoder + heads + sigmoid ----
        head_out = fused_forward_pallas(
            patches, self.w_backbone, self.b_backbone,
            self.w_encoder, self.b_encoder,
            self.w_head, self.b_head,
            ak_cols=self.N_cls)                                   # (M, 128) f32

        # slice lane-padded output: [0:AK) = sigmoid(cls), [AK:AK+A*4) = box deltas
        probs = head_out[:, :self.N_cls].reshape(N, Hf * Wf * A * K)      # (N, HWA*K)
        pred_deltas = head_out[:, self.N_cls:self.N_cls + self.N_reg]
        pred_deltas = pred_deltas.reshape(N, Hf * Wf * A, 4)              # (N, HWA, 4)

        # anchors (single feature level)
        anchors = generate_anchors(Hf, Wf, self.stride, self.anchor_sizes)  # (HWA, 4)

        # ---- batched inference_single_image (top-k, threshold, delta decode) ----
        HWA = Hf * Wf * A
        num_topk = min(self.topk_candidates_test, HWA)
        infer = functools.partial(
            _inference_single,
            num_classes=K, num_topk=num_topk,
            score_threshold=self.score_threshold,
            max_det=self.max_detections_per_image)
        boxes_b, scores_b, classes_b, valid_b = jax.vmap(
            infer, in_axes=(0, 0, None))(probs, pred_deltas, anchors)

        # TODO(synk): batched_nms has no clean Pallas/static-shape equivalent;
        #             return score-sorted top max_detections with a validity mask.
        results = []
        for img in range(N):
            results.append({
                "pred_boxes": boxes_b[img],
                "scores": scores_b[img],
                "pred_classes": classes_b[img],
                "valid": valid_b[img],
            })
        return results


# ---------------------------------- main ------------------------------------

if __name__ == "__main__":
    key = jax.random.PRNGKey(0)
    k_img, k_model = jax.random.split(key)

    # Small deterministic inputs: batch=2, C=3, H=W=32 (NCHW, PyTorch convention).
    images = 255.0 * jax.random.uniform(k_img, (2, 3, 32, 32), jnp.float32)

    model = YOLOFPallas(k_model)
    results = model.forward(images)

    for r in results:
        jax.block_until_ready(r["pred_boxes"])
        jax.block_until_ready(r["scores"])
        jax.block_until_ready(r["pred_classes"])

    # light sanity checks on shapes / values
    assert results[0]["pred_boxes"].shape == (100, 4)
    assert results[0]["scores"].shape == (100,)
    assert results[0]["pred_classes"].shape == (100,)
    assert bool(jnp.all(jnp.isfinite(results[0]["pred_boxes"])))

    print("KERNEL_OK")
</pallas_src>

<mosaic_0001>
module attributes {stable_mosaic.version = 11 : i64} {
  func.func @kernel(%arg0: i32, %arg1: memref<128x32xbf16, #tpu.memory_space<vmem>>, %arg2: memref<32x64xbf16, #tpu.memory_space<vmem>>, %arg3: memref<1x64xf32, #tpu.memory_space<vmem>>, %arg4: memref<64x64xbf16, #tpu.memory_space<vmem>>, %arg5: memref<1x64xf32, #tpu.memory_space<vmem>>, %arg6: memref<64x128xbf16, #tpu.memory_space<vmem>>, %arg7: memref<1x128xf32, #tpu.memory_space<vmem>>, %arg8: memref<128x128xf32, #tpu.memory_space<vmem>>) attributes {dimension_semantics = [#tpu.dimension_semantics<parallel>], iteration_bounds = array<i64: 1>, scalar_prefetch = 0 : i64, scratch_operands = 0 : i64, tpu.core_type = #tpu.core_type<tc>, window_params = [{transform_indices = @transform_0, window_bounds = array<i64: 128, 32>}, {pipeline_mode = #tpu.pipeline_mode<synchronous>, transform_indices = @transform_1, window_bounds = array<i64: 32, 64>}, {pipeline_mode = #tpu.pipeline_mode<synchronous>, transform_indices = @transform_2, window_bounds = array<i64: 1, 64>}, {pipeline_mode = #tpu.pipeline_mode<synchronous>, transform_indices = @transform_3, window_bounds = array<i64: 64, 64>}, {pipeline_mode = #tpu.pipeline_mode<synchronous>, transform_indices = @transform_4, window_bounds = array<i64: 1, 64>}, {pipeline_mode = #tpu.pipeline_mode<synchronous>, transform_indices = @transform_5, window_bounds = array<i64: 64, 128>}, {pipeline_mode = #tpu.pipeline_mode<synchronous>, transform_indices = @transform_6, window_bounds = array<i64: 1, 128>}, {transform_indices = @transform_7, window_bounds = array<i64: 128, 128>}]} {
    %c0 = arith.constant 0 : index
    %c0_0 = arith.constant 0 : index
    %0 = vector.load %arg1[%c0, %c0_0] : memref<128x32xbf16, #tpu.memory_space<vmem>>, vector<128x32xbf16>
    %c0_1 = arith.constant 0 : index
    %c0_2 = arith.constant 0 : index
    %1 = vector.load %arg2[%c0_1, %c0_2] : memref<32x64xbf16, #tpu.memory_space<vmem>>, vector<32x64xbf16>
    %cst = arith.constant dense<0.000000e+00> : vector<128x64xf32>
    %2 = tpu.matmul %0, %1, %cst {dimension_numbers = #tpu.dot_dimension_numbers<[1], [0], [0], [1], [0, 0, 1, 1], [], []>} : vector<128x32xbf16>, vector<32x64xbf16>, vector<128x64xf32> -> vector<128x64xf32>
    %c0_3 = arith.constant 0 : index
    %c0_4 = arith.constant 0 : index
    %3 = vector.load %arg3[%c0_3, %c0_4] : memref<1x64xf32, #tpu.memory_space<vmem>>, vector<1x64xf32>
    %4 = vector.broadcast %3 : vector<1x64xf32> to vector<128x64xf32>
    %5 = arith.addf %2, %4 : vector<128x64xf32>
    %cst_5 = arith.constant 0.000000e+00 : f32
    %6 = vector.broadcast %cst_5 : f32 to vector<128x64xf32>
    %7 = arith.maximumf %5, %6 : vector<128x64xf32>
    %8 = arith.truncf %7 : vector<128x64xf32> to vector<128x64xbf16>
    %c0_6 = arith.constant 0 : index
    %c0_7 = arith.constant 0 : index
    %9 = vector.load %arg4[%c0_6, %c0_7] : memref<64x64xbf16, #tpu.memory_space<vmem>>, vector<64x64xbf16>
    %cst_8 = arith.constant dense<0.000000e+00> : vector<128x64xf32>
    %10 = tpu.matmul %8, %9, %cst_8 {dimension_numbers = #tpu.dot_dimension_numbers<[1], [0], [0], [1], [0, 0, 1, 1], [], []>} : vector<128x64xbf16>, vector<64x64xbf16>, vector<128x64xf32> -> vector<128x64xf32>
    %c0_9 = arith.constant 0 : index
    %c0_10 = arith.constant 0 : index
    %11 = vector.load %arg5[%c0_9, %c0_10] : memref<1x64xf32, #tpu.memory_space<vmem>>, vector<1x64xf32>
    %12 = vector.broadcast %11 : vector<1x64xf32> to vector<128x64xf32>
    %13 = arith.addf %10, %12 : vector<128x64xf32>
    %cst_11 = arith.constant 0.000000e+00 : f32
    %14 = vector.broadcast %cst_11 : f32 to vector<128x64xf32>
    %15 = arith.maximumf %13, %14 : vector<128x64xf32>
    %16 = arith.truncf %15 : vector<128x64xf32> to vector<128x64xbf16>
    %c0_12 = arith.constant 0 : index
    %c0_13 = arith.constant 0 : index
    %17 = vector.load %arg6[%c0_12, %c0_13] : memref<64x128xbf16, #tpu.memory_space<vmem>>, vector<64x128xbf16>
    %cst_14 = arith.constant dense<0.000000e+00> : vector<128x128xf32>
    %18 = tpu.matmul %16, %17, %cst_14 {dimension_numbers = #tpu.dot_dimension_numbers<[1], [0], [0], [1], [0, 0, 1, 1], [], []>} : vector<128x64xbf16>, vector<64x128xbf16>, vector<128x128xf32> -> vector<128x128xf32>
    %c0_15 = arith.constant 0 : index
    %c0_16 = arith.constant 0 : index
    %19 = vector.load %arg7[%c0_15, %c0_16] : memref<1x128xf32, #tpu.memory_space<vmem>>, vector<1x128xf32>
    %20 = vector.broadcast %19 : vector<1x128xf32> to vector<128x128xf32>
    %21 = arith.addf %18, %20 : vector<128x128xf32>
    %22 = tpu.iota {dimensions = array<i32: 1>} : vector<128x128xi32>
    %c40_i32 = arith.constant 40 : i32
    %23 = vector.broadcast %c40_i32 : i32 to vector<128x128xi32>
    %24 = arith.cmpi slt, %22, %23 : vector<128x128xi32>
    %25 = arith.negf %21 : vector<128x128xf32>
    %26 = math.exp %25 : vector<128x128xf32>
    %cst_17 = arith.constant 1.000000e+00 : f32
    %27 = vector.broadcast %cst_17 : f32 to vector<128x128xf32>
    %28 = arith.addf %27, %26 : vector<128x128xf32>
    %29 = arith.divf %27, %28 : vector<128x128xf32>
    %30 = arith.select %24, %29, %21 : vector<128x128xi1>, vector<128x128xf32>
    %c0_18 = arith.constant 0 : index
    %c0_19 = arith.constant 0 : index
    %31 = vector.load %arg8[%c0_18, %c0_19] : memref<128x128xf32, #tpu.memory_space<vmem>>, vector<128x128xf32>
    tpu.vector_store %arg8[%c0_18, %c0_19], %30 {strides = array<i32>} : memref<128x128xf32, #tpu.memory_space<vmem>>, vector<128x128xf32>,
    return
  }
  func.func @transform_0(%arg0: i32) -> (i32, i32) {
    %c0_i32 = arith.constant 0 : i32
    %c0_i32_0 = arith.constant 0 : i32
    return %arg0, %c0_i32 : i32, i32
  }
  func.func @transform_1(%arg0: i32) -> (i32, i32) {
    %c0_i32 = arith.constant 0 : i32
    %c0_i32_0 = arith.constant 0 : i32
    %c0_i32_1 = arith.constant 0 : i32
    return %c0_i32, %c0_i32_0 : i32, i32
  }
  func.func @transform_2(%arg0: i32) -> (i32, i32) {
    %c0_i32 = arith.constant 0 : i32
    %c0_i32_0 = arith.constant 0 : i32
    %c0_i32_1 = arith.constant 0 : i32
    return %c0_i32, %c0_i32_0 : i32, i32
  }
  func.func @transform_3(%arg0: i32) -> (i32, i32) {
    %c0_i32 = arith.constant 0 : i32
    %c0_i32_0 = arith.constant 0 : i32
    %c0_i32_1 = arith.constant 0 : i32
    return %c0_i32, %c0_i32_0 : i32, i32
  }
  func.func @transform_4(%arg0: i32) -> (i32, i32) {
    %c0_i32 = arith.constant 0 : i32
    %c0_i32_0 = arith.constant 0 : i32
    %c0_i32_1 = arith.constant 0 : i32
    return %c0_i32, %c0_i32_0 : i32, i32
  }
  func.func @transform_5(%arg0: i32) -> (i32, i32) {
    %c0_i32 = arith.constant 0 : i32
    %c0_i32_0 = arith.constant 0 : i32
    %c0_i32_1 = arith.constant 0 : i32
    return %c0_i32, %c0_i32_0 : i32, i32
  }
  func.func @transform_6(%arg0: i32) -> (i32, i32) {
    %c0_i32 = arith.constant 0 : i32
    %c0_i32_0 = arith.constant 0 : i32
    %c0_i32_1 = arith.constant 0 : i32
    return %c0_i32, %c0_i32_0 : i32, i32
  }
  func.func @transform_7(%arg0: i32) -> (i32, i32) {
    %c0_i32 = arith.constant 0 : i32
    %c0_i32_0 = arith.constant 0 : i32
    return %arg0, %c0_i32 : i32, i32
  }
}

</mosaic_0001>

<bundles_post_ra>
// kernel: tpu_custom_call.1
= control target key start
LH: loop header
LB: loop body
LE: loop exit
PB: predicated region body
PF: predicated region fallthrough
CT: control target
= control target key end

     0   :  { %vm107_vm0 = vcmask 261120   ;;  %s1280_s0 = inlined_call_operand.vmem [shape: bf16[128,32], index: 0, kind: input, shape index: {}]   ;;  %s1281_s1 = inlined_call_operand.vmem [shape: bf16[32,64], index: 1, kind: input, shape index: {}]   ;;  %s1282_s2 = inlined_call_operand.vmem [shape: f32[1,64], index: 2, kind: input, shape index: {}]   ;;  %s1283_s3 = inlined_call_operand.vmem [shape: bf16[64,64], index: 3, kind: input, shape index: {}]   ;;  %s1284_s4 = inlined_call_operand.vmem [shape: f32[1,64], index: 4, kind: input, shape index: {}]   ;;  %s1285_s5 = inlined_call_operand.vmem [shape: bf16[64,128], index: 5, kind: input, shape index: {}]   ;;  %s1286_s6 = inlined_call_operand.vmem [shape: f32[1,128], index: 6, kind: input, shape index: {}]   ;;  %s1287_s7 = inlined_call_operand.hbm [shape: f32[128,128], index: 7, kind: output, shape index: {}]  }
   0x1   :  { %v915_v0 = vld [vmem:[%s1281_s1] sm:$0xff]   ;;  %v916_v1 = vld [vmem:[%s1281_s1 + $0x8] sm:$0xff]   ;;  %v919_v4 = vld [vmem:[%s1280_s0 + $0x10] sm:$0xff]  }
   0x2   :  { %840 = vmatprep.subr.bf16.mxu0 %v915_v0  ;;  %v917_v2 = vld [vmem:[%s1280_s0] sm:$0xff]   ;;  %908 = vmatprep.subr.bf16.mxu1 %v915_v0  ;;  %v918_v3 = vld [vmem:[%s1280_s0 + $0x8] sm:$0xff]   ;;  %v923_v7 = vld [vmem:[%s1280_s0 + $0x30] sm:$0xff]  }
   0x3   :  { %841 = vmatpush3.bf16.msra.mxu0 %v915_v0  ;;  %910 = vmatpush3.bf16.msra.mxu1 %v915_v0  ;;  %v921_v5 = vld [vmem:[%s1280_s0 + $0x20] sm:$0xff]   ;;  %v922_v6 = vld [vmem:[%s1280_s0 + $0x28] sm:$0xff]   ;;  %v920_v10 = vld [vmem:[%s1280_s0 + $0x18] sm:$0xff]  }
   0x4   :  { %842 = vmatprep.subr.bf16.mxu0 %v916_v1  ;;  %844 = vmatprep.mubr.msk.bf16.mxu0 %vm107_vm0, %v917_v2  ;;  %v925_v8 = vld [vmem:[%s1283_s3] sm:$0xff]   ;;  %v926_v9 = vld [vmem:[%s1283_s3 + $0x8] sm:$0xff]   ;;  %v924_v11 = vld [vmem:[%s1280_s0 + $0x38] sm:$0xff]  }
   0x5   :  { %909 = vmatprep.subr.bf16.mxu1 %v916_v1  ;;  %852 = vmatprep.mubr.msk.bf16.mxu1 %vm107_vm0, %v921_v5 }
   0x7   :  { %843 = vmatpush3.bf16.msra.mxu0 %v916_v1  ;;  %911 = vmatpush3.bf16.msra.mxu1 %v916_v1 }
   0x8   :  { %860 = vmatprep.subr.bf16.mxu1 %v925_v8 }
   0xa   :  { %845 = vmatmul.mubr.msk.bf16.vlgmr.msra.gmra.mrb[0].mxu0 %vm107_vm0, %v918_v3  ;;  %853 = vmatmul.mubr.msk.bf16.vlgmr.msra.gmra.mrb[0].mxu1 %vm107_vm0, %v922_v6 }
   0xb   :  { %848 = vmatprep.mubr.msk.bf16.mxu0 %vm107_vm0, %v919_v4  ;;  %856 = vmatprep.mubr.msk.bf16.mxu1 %vm107_vm0, %v923_v7 }
   0xc   :  { %861 = vmatpush3.bf16.msra.mxu1 %v925_v8 }
   0xd   :  { %862 = vmatprep.subr.bf16.mxu1 %v926_v9 }
   0xe   :  { %12 = vsyncpa [#allocation3], 0  ;;  %v927_v12 = vld [vmem:[%s1283_s3 + $0x10] sm:$0xff]   ;;  %v928_v13 = vld [vmem:[%s1283_s3 + $0x18] sm:$0xff]   ;;  %vm292_vm1 = vcmask 523264  }
   0xf   :  { %v929_v14 = vld [vmem:[%s1285_s5] sm:$0xff]   ;;  %v930_v15 = vld [vmem:[%s1285_s5 + $0x8] sm:$0xff]  }
  0x10   :  { %863 = vmatpush3.bf16.msra.mxu1 %v926_v9  ;;  %884 = vmatprep.subr.bf16.mxu0 %v929_v14  ;;  %v745_v16 = vld [vmem:[%s1282_s2] ss:$0 sm:$0xff]  ;;  %v931_v9 = vld [vmem:[%s1285_s5 + $0x10] sm:$0xff]  }
  0x11   :  { %864 = vmatprep.subr.bf16.mxu1 %v927_v12  ;;  %885 = vmatpush3.bf16.msra.mxu0 %v929_v14 }
  0x12   :  { %849 = vmatmul.mubr.msk.bf16.gmra.mrb[4].mxu0 %vm107_vm0, %v920_v10  ;;  %857 = vmatmul.mubr.msk.bf16.gmra.mrb[4].mxu1 %vm107_vm0, %v924_v11  ;;  %v932_v10 = vld [vmem:[%s1285_s5 + $0x18] sm:$0xff]   ;;  %v764_v11 = vld [vmem:[%s1284_s4] ss:$0 sm:$0xff] }
  0x13   :  { %886 = vmatprep.subr.bf16.mxu0 %v930_v15 }
  0x14   :  { %865 = vmatpush3.bf16.msra.mxu1 %v927_v12 }
  0x15   :  { %866 = vmatprep.subr.bf16.mxu1 %v928_v13  ;;  %887 = vmatpush3.bf16.msra.mxu0 %v930_v15 }
  0x16   :  { %888 = vmatprep.subr.bf16.mxu0 %v931_v9 }
  0x18   :  { %867 = vmatpush3.bf16.msra.mxu1 %v928_v13 }
  0x19   :  { %889 = vmatpush3.bf16.msra.mxu0 %v931_v9 }
  0x1a   :  { %890 = vmatprep.subr.bf16.mxu0 %v932_v10 }
  0x1d   :  { %891 = vmatpush3.bf16.msra.mxu0 %v932_v10 }
  0xdd   :  { %v846_v17 = vpop.f32.mrb[0].mxu0  ;;  %v854_v18 = vpop.f32.mrb[0].mxu1 }
  0xde   :  { %v175_v19 = vadd.f32 %v846_v17, %v745_v16  ;;  %v166_v20 = vpop.f32.mrb[1].mxu0  ;;  %v207_v21 = vadd.f32 %v854_v18, %v745_v16  ;;  %v198_v22 = vpop.f32.mrb[1].mxu1 }
  0xdf   :  { %v167_v23 = vadd.f32 %v745_v16, %v166_v20  ;;  %v847_v24 = vpop.f32.mrb[2].mxu0  ;;  %v199_v25 = vadd.f32 %v745_v16, %v198_v22  ;;  %v855_v26 = vpop.f32.mrb[2].mxu1 }
  0xe0   :  { %v178_v27 = vadd.f32 %v847_v24, %v745_v16  ;;  %v169_v28 = vpop.f32.mrb[3].mxu0  ;;  %v239_v29 = vmax.f32 %v207_v21, 0.0  ;;  %v210_v30 = vadd.f32 %v855_v26, %v745_v16  ;;  %v201_v31 = vpop.f32.mrb[3].mxu1  ;;  %v231_v35 = vmax.f32 %v175_v19, 0.0 }
  0xe1   :  { %v170_v32 = vadd.f32 %v745_v16, %v169_v28  ;;  %v237_v33 = vmax.f32 %v199_v25, 0.0  ;;  %v202_v34 = vadd.f32 %v745_v16, %v201_v31  ;;  %v229_v38 = vmax.f32 %v167_v23, 0.0 }
  0xe2   :  { %v232_v36 = vmax.f32 %v178_v27, 0.0  ;;  %v240_v37 = vmax.f32 %v210_v30, 0.0 }
  0xe3   :  { %v230_v39 = vmax.f32 %v170_v32, 0.0  ;;  %v238_v40 = vmax.f32 %v202_v34, 0.0 }
  0xe4   :  { %v246_v41 = vpack.c.bf16 %v232_v36, %v231_v35  ;;  %v250_v42 = vpack.c.bf16 %v240_v37, %v239_v29 }
  0xe5   :  { %v245_v43 = vpack.c.bf16 %v230_v39, %v229_v38  ;;  %v850_v44 = vpop.f32.mrb[4].mxu0  ;;  %v249_v45 = vpack.c.bf16 %v238_v40, %v237_v33  ;;  %v858_v46 = vpop.f32.mrb[4].mxu1 }
  0xe6   :  { %v191_v47 = vadd.f32 %v850_v44, %v745_v16  ;;  %v182_v48 = vpop.f32.mrb[5].mxu0  ;;  %v223_v49 = vadd.f32 %v858_v46, %v745_v16  ;;  %v214_v50 = vpop.f32.mrb[5].mxu1 }
  0xe7   :  { %v183_v51 = vadd.f32 %v745_v16, %v182_v48  ;;  %v851_v52 = vpop.f32.mrb[6].mxu0  ;;  %868 = vmatprep.mubr.msk.bf16.mxu1 %vm292_vm1, %v245_v43  ;;  %v215_v53 = vadd.f32 %v745_v16, %v214_v50  ;;  %v859_v54 = vpop.f32.mrb[6].mxu1 }
  0xe8   :  { %v194_v55 = vadd.f32 %v851_v52, %v745_v16  ;;  %v185_v56 = vpop.f32.mrb[7].mxu0  ;;  %869 = vmatmul.mubr.msk.bf16.vlgmr.msra.gmra.mrb[8].mxu1 %vm292_vm1, %v246_v41  ;;  %v243_v57 = vmax.f32 %v223_v49, 0.0  ;;  %v226_v58 = vadd.f32 %v859_v54, %v745_v16  ;;  %v217_v59 = vpop.f32.mrb[7].mxu1  ;;  %v235_v63 = vmax.f32 %v191_v47, 0.0 }
  0xe9   :  { %v186_v60 = vadd.f32 %v745_v16, %v185_v56  ;;  %v241_v61 = vmax.f32 %v215_v53, 0.0  ;;  %v218_v62 = vadd.f32 %v745_v16, %v217_v59  ;;  %v233_v2 = vmax.f32 %v183_v51, 0.0 }
  0xea   :  { %v236_v0 = vmax.f32 %v194_v55, 0.0  ;;  %v244_v1 = vmax.f32 %v226_v58, 0.0 }
  0xeb   :  { %v234_v3 = vmax.f32 %v186_v60, 0.0  ;;  %v242_v4 = vmax.f32 %v218_v62, 0.0 }
  0xec   :  { %v248_v5 = vpack.c.bf16 %v236_v0, %v235_v63  ;;  %v252_v6 = vpack.c.bf16 %v244_v1, %v243_v57 }
  0xed   :  { %v247_v7 = vpack.c.bf16 %v234_v3, %v233_v2  ;;  %v251_v8 = vpack.c.bf16 %v242_v4, %v241_v61  ;;  %v1151_v4 = vld [vmem:[%s1286_s6] ss:$0 sm:$0xff]  ;;  %s1021_s6 = smov [#allocation2]  }
  0xee   :  { %s734_s13 = sshll.u32 %s1021_s6, 4  ;;  %s735_s13 = int_to_ptr.vmem [resolvable:$true] %s734_s13 }
  0xef   :  { %872 = vmatprep.mubr.msk.bf16.mxu1 %vm292_vm1, %v247_v7  ;;  %s997_s14 = scalar_lea.vmem %s735_s13, 2048  ;;  %p1002_p1 = scmp.lt.s32.totalorder %s735_s13, %s735_s13 }
  0xf0   :  { %873 = vmatmul.mubr.msk.bf16.gmra.mrb[12].mxu1 %vm292_vm1, %v248_v5  ;;  %p998_p0 = scmp.ne.s32.totalorder %s735_s13, %s997_s14  ;;  %p1003_p2 = scmp.lt.s32.totalorder %s997_s14, %s997_s14 }
  0xf1   :  { %876 = vmatprep.mubr.msk.bf16.mxu1 %vm292_vm1, %v249_v45 }
  0xf2   :  { %p1004_p3 = por %p1003_p2, %p1002_p1 }
  0xf4   :  { %p1005_p4 = pnand %p1004_p3, %p998_p0 }
  0xf8   :  { %877 = vmatmul.mubr.msk.bf16.gmra.mrb[16].mxu1 %vm292_vm1, %v250_v42 }
  0xf9   :  { %880 = vmatprep.mubr.msk.bf16.mxu1 %vm292_vm1, %v251_v8 }
 0x100   :  { %881 = vmatmul.mubr.msk.bf16.gmra.mrb[20].mxu1 %vm292_vm1, %v252_v6 }
 0x1bb   :  { %v870_v12 = vpop.f32.mrb[8].mxu1 }
 0x1bc   :  { %v360_v13 = vadd.f32 %v870_v12, %v764_v11  ;;  %v351_v14 = vpop.f32.mrb[9].mxu1 }
 0x1bd   :  { %v352_v15 = vadd.f32 %v764_v11, %v351_v14  ;;  %v871_v16 = vpop.f32.mrb[10].mxu1 }
 0x1be   :  { %v363_v17 = vadd.f32 %v871_v16, %v764_v11  ;;  %v354_v18 = vpop.f32.mrb[11].mxu1  ;;  %v416_v20 = vmax.f32 %v360_v13, 0.0 }
 0x1bf   :  { %v355_v19 = vadd.f32 %v764_v11, %v354_v18  ;;  %v414_v22 = vmax.f32 %v352_v15, 0.0 }
 0x1c0   :  { %v417_v21 = vmax.f32 %v363_v17, 0.0 }
 0x1c1   :  { %v415_v23 = vmax.f32 %v355_v19, 0.0 }
 0x1c2   :  { %v431_v24 = vpack.c.bf16 %v417_v21, %v416_v20 }
 0x1c3   :  { %v430_v25 = vpack.c.bf16 %v415_v23, %v414_v22  ;;  %v874_v26 = vpop.f32.mrb[12].mxu1 }
 0x1c4   :  { %v376_v27 = vadd.f32 %v874_v26, %v764_v11  ;;  %v367_v28 = vpop.f32.mrb[13].mxu1 }
 0x1c5   :  { %v368_v29 = vadd.f32 %v764_v11, %v367_v28  ;;  %v875_v30 = vpop.f32.mrb[14].mxu1  ;;  %892 = vmatprep.mubr.msk.bf16.mxu0 %vm292_vm1, %v430_v25 }
 0x1c6   :  { %v379_v31 = vadd.f32 %v875_v30, %v764_v11  ;;  %v370_v32 = vpop.f32.mrb[15].mxu1  ;;  %893 = vmatmul.mubr.msk.bf16.vlgmr.msra.gmra.mrb[8].mxu0 %vm292_vm1, %v431_v24  ;;  %v420_v34 = vmax.f32 %v376_v27, 0.0 }
 0x1c7   :  { %v371_v33 = vadd.f32 %v764_v11, %v370_v32  ;;  %v418_v36 = vmax.f32 %v368_v29, 0.0 }
 0x1c8   :  { %v421_v35 = vmax.f32 %v379_v31, 0.0 }
 0x1c9   :  { %v419_v37 = vmax.f32 %v371_v33, 0.0 }
 0x1ca   :  { %v433_v38 = vpack.c.bf16 %v421_v35, %v420_v34 }
 0x1cb   :  { %v432_v39 = vpack.c.bf16 %v419_v37, %v418_v36  ;;  %v878_v40 = vpop.f32.mrb[16].mxu1 }
 0x1cc   :  { %v392_v41 = vadd.f32 %v878_v40, %v764_v11  ;;  %v383_v42 = vpop.f32.mrb[17].mxu1 }
 0x1cd   :  { %v384_v43 = vadd.f32 %v764_v11, %v383_v42  ;;  %v879_v44 = vpop.f32.mrb[18].mxu1  ;;  %896 = vmatprep.mubr.msk.bf16.mxu0 %vm292_vm1, %v432_v39 }
 0x1ce   :  { %v395_v45 = vadd.f32 %v879_v44, %v764_v11  ;;  %v386_v46 = vpop.f32.mrb[19].mxu1  ;;  %897 = vmatmul.mubr.msk.bf16.gmra.mrb[12].mxu0 %vm292_vm1, %v433_v38  ;;  %v424_v48 = vmax.f32 %v392_v41, 0.0  ;;  %v598_v38 = vlaneseq }
 0x1cf   :  { %v387_v47 = vadd.f32 %v764_v11, %v386_v46  ;;  %v422_v50 = vmax.f32 %v384_v43, 0.0 }
 0x1d0   :  { %v425_v49 = vmax.f32 %v395_v45, 0.0 }
 0x1d1   :  { %v423_v51 = vmax.f32 %v387_v47, 0.0 }
 0x1d2   :  { %v435_v52 = vpack.c.bf16 %v425_v49, %v424_v48  ;;  %v1200_v49 = vand.u32 127, %v598_v38 }
 0x1d3   :  { %v434_v53 = vpack.c.bf16 %v423_v51, %v422_v50  ;;  %v882_v54 = vpop.f32.mrb[20].mxu1 }
 0x1d4   :  { %v408_v55 = vadd.f32 %v882_v54, %v764_v11  ;;  %v399_v56 = vpop.f32.mrb[21].mxu1  ;;  %vm600_vm2 = vcmp.lt.s32.totalorder %v1200_v49, 40 }
 0x1d5   :  { %v400_v57 = vadd.f32 %v764_v11, %v399_v56  ;;  %v883_v58 = vpop.f32.mrb[22].mxu1  ;;  %900 = vmatprep.mubr.msk.bf16.mxu0 %vm292_vm1, %v434_v53 }
 0x1d6   :  { %v411_v59 = vadd.f32 %v883_v58, %v764_v11  ;;  %v402_v60 = vpop.f32.mrb[23].mxu1  ;;  %901 = vmatmul.mubr.msk.bf16.gmra.mrb[16].mxu0 %vm292_vm1, %v435_v52  ;;  %v428_v62 = vmax.f32 %v408_v55, 0.0 }
 0x1d7   :  { %v403_v61 = vadd.f32 %v764_v11, %v402_v60  ;;  %v426_v0 = vmax.f32 %v400_v57, 0.0 }
 0x1d8   :  { %v429_v63 = vmax.f32 %v411_v59, 0.0 }
 0x1d9   :  { %v427_v1 = vmax.f32 %v403_v61, 0.0 }
 0x1da   :  { %v437_v2 = vpack.c.bf16 %v429_v63, %v428_v62 }
 0x1db   :  { %v436_v3 = vpack.c.bf16 %v427_v1, %v426_v0 }
 0x1dd   :  { %904 = vmatprep.mubr.msk.bf16.mxu0 %vm292_vm1, %v436_v3 }
 0x1de   :  { %905 = vmatmul.mubr.msk.bf16.gmra.mrb[20].mxu0 %vm292_vm1, %v437_v2 }
 0x299   :  { %v894_v5 = vpop.f32.mrb[8].mxu0 }
 0x29a   :  { %v1154_v6 = vadd.f32 %v894_v5, %v1151_v4  ;;  %v535_v7 = vpop.f32.mrb[9].mxu0 }
 0x29b   :  { %v1157_v8 = vadd.f32 %v1151_v4, %v535_v7  ;;  %v895_v9 = vpop.f32.mrb[10].mxu0 }
 0x29c   :  { %v792_v10 = vmul.f32 -1.442695, %v1154_v6  ;;  %v1161_v11 = vadd.f32 %v895_v9, %v1151_v4  ;;  %v538_v12 = vpop.f32.mrb[11].mxu0 }
 0x29d   :  { %v790_v13 = vmul.f32 -1.442695, %v1157_v8  ;;  %v1165_v14 = vadd.f32 %v1151_v4, %v538_v12 }
 0x29e   :  { %933 = vpow2.f32 %v792_v10  ;;  %v793_v15 = vmul.f32 -1.442695, %v1161_v11 }
 0x29f   :  { %935 = vpow2.f32 %v790_v13  ;;  %v791_v16 = vmul.f32 -1.442695, %v1165_v14 }
 0x2a0   :  { %937 = vpow2.f32 %v793_v15 }
 0x2a1   :  { %939 = vpow2.f32 %v791_v16  ;;  %v898_v17 = vpop.f32.mrb[12].mxu0 }
 0x2a2   :  { %v1170_v18 = vadd.f32 %v898_v17, %v1151_v4  ;;  %v551_v19 = vpop.f32.mrb[13].mxu0 }
 0x2a3   :  { %v1173_v20 = vadd.f32 %v1151_v4, %v551_v19  ;;  %v899_v21 = vpop.f32.mrb[14].mxu0 }
 0x2a4   :  { %v796_v22 = vmul.f32 -1.442695, %v1170_v18  ;;  %v1177_v23 = vadd.f32 %v899_v21, %v1151_v4  ;;  %v554_v24 = vpop.f32.mrb[15].mxu0 }
 0x2a5   :  { %v794_v25 = vmul.f32 -1.442695, %v1173_v20  ;;  %v1181_v26 = vadd.f32 %v1151_v4, %v554_v24 }
 0x2a6   :  { %941 = vpow2.f32 %v796_v22  ;;  %v797_v27 = vmul.f32 -1.442695, %v1177_v23 }
 0x2a7   :  { %943 = vpow2.f32 %v794_v25  ;;  %v795_v28 = vmul.f32 -1.442695, %v1181_v26 }
 0x2a8   :  { %v934_v29 = vpop.eup %933  ;;  %945 = vpow2.f32 %v797_v27 }
 0x2a9   :  { %v936_v30 = vpop.eup %935  ;;  %v651_v31 = vadd.f32 1.0, %v934_v29  ;;  %947 = vpow2.f32 %v795_v28  ;;  %v902_v32 = vpop.f32.mrb[16].mxu0 }
 0x2aa   :  { %v938_v33 = vpop.eup %937  ;;  %v649_v34 = vadd.f32 1.0, %v936_v30  ;;  %v1186_v35 = vadd.f32 %v902_v32, %v1151_v4  ;;  %v567_v36 = vpop.f32.mrb[17].mxu0 }
 0x2ab   :  { %v940_v37 = vpop.eup %939  ;;  %949 = vrcp.f32 %v651_v31  ;;  %v652_v39 = vadd.f32 1.0, %v938_v33  ;;  %v1189_v40 = vadd.f32 %v1151_v4, %v567_v36  ;;  %v903_v41 = vpop.f32.mrb[18].mxu0 }
 0x2ac   :  { %951 = vrcp.f32 %v649_v34  ;;  %v650_v42 = vadd.f32 1.0, %v940_v37  ;;  %v800_v43 = vmul.f32 -1.442695, %v1186_v35  ;;  %v1193_v44 = vadd.f32 %v903_v41, %v1151_v4  ;;  %v570_v45 = vpop.f32.mrb[19].mxu0 }
 0x2ad   :  { %953 = vrcp.f32 %v652_v39  ;;  %v798_v46 = vmul.f32 -1.442695, %v1189_v40  ;;  %v1197_v47 = vadd.f32 %v1151_v4, %v570_v45 }
 0x2ae   :  { %955 = vrcp.f32 %v650_v42  ;;  %v801_v48 = vmul.f32 -1.442695, %v1193_v44 }
 0x2af   :  { %957 = vpow2.f32 %v800_v43  ;;  %v799_v50 = vmul.f32 -1.442695, %v1197_v47 }
 0x2b0   :  { %v942_v51 = vpop.eup %941  ;;  %959 = vpow2.f32 %v798_v46 }
 0x2b1   :  { %v944_v52 = vpop.eup %943  ;;  %v655_v53 = vadd.f32 1.0, %v942_v51  ;;  %961 = vpow2.f32 %v801_v48  ;;  %v906_v54 = vpop.f32.mrb[20].mxu0 }
 0x2b2   :  { %v946_v55 = vpop.eup %945  ;;  %v653_v56 = vadd.f32 1.0, %v944_v52  ;;  %963 = vpow2.f32 %v799_v50  ;;  %v1204_v57 = vadd.f32 %v906_v54, %v1151_v4  ;;  %v583_v58 = vpop.f32.mrb[21].mxu0 }
 0x2b3   :  { %v948_v59 = vpop.eup %947  ;;  %965 = vrcp.f32 %v655_v53  ;;  %v656_v60 = vadd.f32 1.0, %v946_v55  ;;  %v1208_v61 = vadd.f32 %v1151_v4, %v583_v58  ;;  %v907_v62 = vpop.f32.mrb[22].mxu0 }
 0x2b4   :  { %967 = vrcp.f32 %v653_v56  ;;  %v654_v63 = vadd.f32 1.0, %v948_v59  ;;  %v804_v0 = vmul.f32 -1.442695, %v1204_v57  ;;  %v1212_v1 = vadd.f32 %v907_v62, %v1151_v4  ;;  %v586_v2 = vpop.f32.mrb[23].mxu0 }
 0x2b5   :  { %v950_v3 = vpop.eup %949  ;;  %969 = vrcp.f32 %v656_v60  ;;  %v802_v5 = vmul.f32 -1.442695, %v1208_v61  ;;  %v1216_v7 = vadd.f32 %v1151_v4, %v586_v2 }
 0x2b6   :  { %v952_v9 = vpop.eup %951  ;;  %v699_v10 = vsel %vm600_vm2, %v950_v3, %v1154_v6  ;;  %971 = vrcp.f32 %v654_v63  ;;  %v805_v12 = vmul.f32 -1.442695, %v1212_v1 }
 0x2b7   :  { %v954_v13 = vpop.eup %953  ;;  %715 = vst [vmem:[#allocation2 + $0x10] sm:$0xff] %v699_v10  ;;  %v697_v15 = vsel %vm600_vm2, %v952_v9, %v1157_v8  ;;  %973 = vpow2.f32 %v804_v0  ;;  %v803_v16 = vmul.f32 -1.442695, %v1216_v7 }
 0x2b8   :  { %v956_v17 = vpop.eup %955  ;;  %713 = vst [vmem:[#allocation2] sm:$0xff] %v697_v15  ;;  %v700_v4 = vsel %vm600_vm2, %v954_v13, %v1161_v11  ;;  %975 = vpow2.f32 %v802_v5 }
 0x2b9   :  { %v958_v6 = vpop.eup %957  ;;  %716 = vst [vmem:[#allocation2 + $0x18] sm:$0xff] %v700_v4  ;;  %v698_v19 = vsel %vm600_vm2, %v956_v17, %v1165_v14  ;;  %977 = vpow2.f32 %v805_v12 }
 0x2ba   :  { %v960_v21 = vpop.eup %959  ;;  %714 = vst [vmem:[#allocation2 + $0x8] sm:$0xff] %v698_v19  ;;  %v659_v8 = vadd.f32 1.0, %v958_v6  ;;  %979 = vpow2.f32 %v803_v16 }
 0x2bb   :  { %v962_v22 = vpop.eup %961  ;;  %v657_v24 = vadd.f32 1.0, %v960_v21 }
 0x2bc   :  { %v964_v25 = vpop.eup %963  ;;  %981 = vrcp.f32 %v659_v8  ;;  %v660_v27 = vadd.f32 1.0, %v962_v22 }
 0x2bd   :  { %v966_v28 = vpop.eup %965  ;;  %983 = vrcp.f32 %v657_v24  ;;  %v658_v11 = vadd.f32 1.0, %v964_v25 }
 0x2be   :  { %v968_v29 = vpop.eup %967  ;;  %v703_v30 = vsel %vm600_vm2, %v966_v28, %v1170_v18  ;;  %985 = vrcp.f32 %v660_v27 }
 0x2bf   :  { %v970_v14 = vpop.eup %969  ;;  %719 = vst [vmem:[#allocation2 + $0x30] sm:$0xff] %v703_v30  ;;  %v701_v31 = vsel %vm600_vm2, %v968_v29, %v1173_v20  ;;  %987 = vrcp.f32 %v658_v11 }
 0x2c0   :  { %v972_v32 = vpop.eup %971  ;;  %717 = vst [vmem:[#allocation2 + $0x20] sm:$0xff] %v701_v31  ;;  %v704_v33 = vsel %vm600_vm2, %v970_v14, %v1177_v23 }
 0x2c1   :  { %v974_v34 = vpop.eup %973  ;;  %720 = vst [vmem:[#allocation2 + $0x38] sm:$0xff] %v704_v33  ;;  %v702_v18 = vsel %vm600_vm2, %v972_v32, %v1181_v26 }
 0x2c2   :  { %v976_v36 = vpop.eup %975  ;;  %718 = vst [vmem:[#allocation2 + $0x28] sm:$0xff] %v702_v18  ;;  %v663_v37 = vadd.f32 1.0, %v974_v34 }
 0x2c3   :  { %v978_v38 = vpop.eup %977  ;;  %v661_v39 = vadd.f32 1.0, %v976_v36 }
 0x2c4   :  { %v980_v41 = vpop.eup %979  ;;  %989 = vrcp.f32 %v663_v37  ;;  %v664_v20 = vadd.f32 1.0, %v978_v38 }
 0x2c5   :  { %991 = vrcp.f32 %v661_v39  ;;  %v662_v42 = vadd.f32 1.0, %v980_v41 }
 0x2c6   :  { %v982_v43 = vpop.eup %981  ;;  %993 = vrcp.f32 %v664_v20 }
 0x2c7   :  { %v984_v45 = vpop.eup %983  ;;  %v707_v23 = vsel %vm600_vm2, %v982_v43, %v1186_v35  ;;  %995 = vrcp.f32 %v662_v42 }
 0x2c8   :  { %v986_v46 = vpop.eup %985  ;;  %723 = vst [vmem:[#allocation2 + $0x50] sm:$0xff] %v707_v23  ;;  %v705_v26 = vsel %vm600_vm2, %v984_v45, %v1189_v40 }
 0x2c9   :  { %v988_v48 = vpop.eup %987  ;;  %721 = vst [vmem:[#allocation2 + $0x40] sm:$0xff] %v705_v26  ;;  %v708_v50 = vsel %vm600_vm2, %v986_v46, %v1193_v44 }
 0x2ca   :  { %724 = vst [vmem:[#allocation2 + $0x58] sm:$0xff] %v708_v50  ;;  %v706_v51 = vsel %vm600_vm2, %v988_v48, %v1197_v47 }
 0x2cb   :  { %722 = vst [vmem:[#allocation2 + $0x48] sm:$0xff] %v706_v51 }
 0x2ce   :  { %v990_v35 = vpop.eup %989 }
 0x2cf   :  { %v992_v52 = vpop.eup %991  ;;  %v711_v40 = vsel %vm600_vm2, %v990_v35, %v1204_v57 }
 0x2d0   :  { %v994_v53 = vpop.eup %993  ;;  %727 = vst [vmem:[#allocation2 + $0x70] sm:$0xff] %v711_v40  ;;  %v709_v44 = vsel %vm600_vm2, %v992_v52, %v1208_v61 }
 0x2d1   :  { %v996_v54 = vpop.eup %995  ;;  %725 = vst [vmem:[#allocation2 + $0x60] sm:$0xff] %v709_v44  ;;  %v712_v47 = vsel %vm600_vm2, %v994_v53, %v1212_v1 }
 0x2d2   :  { %728 = vst [vmem:[#allocation2 + $0x78] sm:$0xff] %v712_v47  ;;  %v710_v55 = vsel %vm600_vm2, %v996_v54, %v1216_v7 }
 0x2d3   :  { %726 = vst [vmem:[#allocation2 + $0x68] sm:$0xff] %v710_v55 }
 0x2d4   :  { %1008 = shalt.err (!%p1005_p4)
}
 0x2d5   :  { %s1009_s17 = scalar_lea.hbm %s1287_s7, 2048 }
 0x2d6   :  { %p1010_p5 = scmp.ne.s32.totalorder %s1287_s7, %s1009_s17  ;;  %p1013_p6 = scmp.lt.u32.totalorder %s1009_s17, %s1287_s7 }
 0x2d8   :  { %p1015_p7 = pnand %p1013_p6, %p1010_p5 }
 0x2da   :  { %1018 = shalt.err (!%p1015_p7)
}
 0x2db   :  { %s1022_s22 = smov 128   ;;  %s1023_s23 = smov 8  }
 0x2dc   :  { %740 = dma.vmem_to_hbm [thread:$0]  %s735_s13, 2048, %s1287_s7, [#allocation3], %s1022_s22, %s1022_s22, %s1023_s23  }
 0x2dd   :  { %1019 = dma.done.wait [#allocation3], 2048  }
 0x2de   :  { %1020 = vsyncadd [#allocation3], 4294965248 }
 0x2df   :  { %744 = vsyncpa [#allocation3], 1 }

</bundles_post_ra>
